<compile_context>
chip_gen: v5e
topology: v5e:2x2
jax: 0.10.0
libtpu: 0.0.40
codegen_flags: <defaults>
</compile_context>

<pallas_src>
import functools
import numpy as np
import jax
import jax.numpy as jnp
from jax.experimental import pallas as pl
from jax.experimental.pallas import tpu as pltpu

LANE = 128      # lane width: last dim of every tensor is padded to this
SUBLANE = 8     # sublane granularity for the batch axis


def _round_up(n, m):
    return ((n + m - 1) // m) * m


# ---------------- Fused MLP kernel ----------------
def _fused_mlp_kernel(*refs, num_layers, apply_relu_last, compute_dtype):
    # refs layout: x_ref, (w0_ref, b0_ref), (w1_ref, b1_ref), ..., o_ref
    x_ref = refs[0]
    o_ref = refs[-1]
    param_refs = refs[1:-1]

    h = x_ref[...]                                   # (tm, Din_p), compute_dtype
    for i in range(num_layers):                      # static unrolled layer loop
        w = param_refs[2 * i][...]                   # (Din_p, Dout_p), compute_dtype
        b = param_refs[2 * i + 1][...]               # (1, Dout_p), f32
        # MXU matmul with f32 accumulation.
        y = jnp.dot(h, w, preferred_element_type=jnp.float32)
        # bias add + ReLU kept in f32 on the VPU (v5e has no bf16 VPU path).
        y = y + b
        if i < num_layers - 1 or apply_relu_last:
            y = jnp.maximum(y, 0.0)
        # Next layer's activation stays in VMEM; cast only between layers.
        h = y.astype(compute_dtype) if i < num_layers - 1 else y
    o_ref[...] = h.astype(o_ref.dtype)


# ---------------- Wrapper: padding, BlockSpecs, grid ----------------
def mlp_base_forward(x, params, *, apply_relu_last=True,
                     compute_dtype=jnp.float32, tm=256):
    """Fused MLPBase forward.

    x:      [B, Din] float32
    params: list of (w_t [in, out] float32, b [out] float32) per layer
    """
    B, Din = x.shape
    num_layers = len(params)
    assert num_layers >= 1
    assert params[0][0].shape[0] == Din
    for i in range(num_layers - 1):
        assert params[i][0].shape[1] == params[i + 1][0].shape[0]

    # Lane-dense padding of every feature dim; sublane padding of the batch.
    din_p = [_round_up(p[0].shape[0], LANE) for p in params]
    dout_p = [_round_up(p[0].shape[1], LANE) for p in params]

    Bp = _round_up(B, SUBLANE)
    tm_eff = min(tm, Bp)
    Bp = _round_up(Bp, tm_eff)
    grid_m = Bp // tm_eff

    # Zero-padded input (zero columns hit zero weight rows -> no contamination).
    x_p = jnp.zeros((Bp, din_p[0]), dtype=compute_dtype)
    x_p = x_p.at[:B, :Din].set(x.astype(compute_dtype))

    padded = []
    in_specs = [pl.BlockSpec((tm_eff, din_p[0]), lambda m: (m, 0))]
    for i, (w_t, b) in enumerate(params):
        di, do = w_t.shape
        w_pad = jnp.zeros((din_p[i], dout_p[i]), dtype=compute_dtype)
        w_pad = w_pad.at[:di, :do].set(w_t.astype(compute_dtype))
        b_pad = jnp.zeros((1, dout_p[i]), dtype=jnp.float32)
        b_pad = b_pad.at[0, :do].set(b.astype(jnp.float32))
        padded += [w_pad, b_pad]
        # Constant block index -> weights/bias stay resident across the M grid.
        in_specs += [pl.BlockSpec((din_p[i], dout_p[i]), lambda m: (0, 0)),
                     pl.BlockSpec((1, dout_p[i]), lambda m: (0, 0))]

    Dout = params[-1][0].shape[1]
    out_spec = pl.BlockSpec((tm_eff, dout_p[-1]), lambda m: (m, 0))

    # Crude VMEM budget check, sized against v7x's 64 MiB physical / 32 MiB scoped.
    param_bytes = sum(int(np.prod(p.shape)) * p.dtype.itemsize for p in padded)
    act_bytes = tm_eff * max([din_p[0]] + dout_p) * 4
    vmem_needed = 2 * param_bytes + 6 * act_bytes
    # TODO(synk): add K/N tiling with a pltpu.VMEM f32 accumulator (pl.when init/
    # finalize, K axis last & "arbitrary") once a single layer's padded weights no
    # longer fit the ~24 MiB resident-weight budget.
    assert vmem_needed < 24 * 1024 * 1024, "layer too large for fused resident-weight kernel"

    kernel = functools.partial(
        _fused_mlp_kernel,
        num_layers=num_layers,
        apply_relu_last=apply_relu_last,
        compute_dtype=compute_dtype,
    )

    out_p = pl.pallas_call(
        kernel,
        out_shape=jax.ShapeDtypeStruct((Bp, dout_p[-1]), jnp.float32),
        grid=(grid_m,),
        in_specs=in_specs,
        out_specs=out_spec,
        compiler_params=pltpu.CompilerParams(
            dimension_semantics=("parallel",),        # shard M across v7x's 2 TCs
            vmem_limit_bytes=32 * 1024 * 1024,
        ),
    )(x_p, *padded)

    # Strip batch/feature padding.
    return out_p[:B, :Dout]


# ---------------- Parameter init, matching the PyTorch module semantics ----------------
def _fanin_bound(weight_shape):
    # PyTorch weight is [out, in]; _fanin_init uses size[0] for 2-D tensors,
    # i.e. fan_in = out_features (quirky but we reproduce it exactly).
    return float(np.sqrt(1.0 / weight_shape[0]))


def init_mlp_params(key, input_shape, hidden_shapes):
    """Returns list of (w_t [in,out], b [out]) per layer, deterministic from key."""
    params = []
    in_dim = int(np.prod(input_shape))
    for next_shape in hidden_shapes:
        key, wk = jax.random.split(key)
        bound = _fanin_bound((next_shape, in_dim))          # torch weight shape [out, in]
        w = jax.random.uniform(wk, (next_shape, in_dim), jnp.float32,
                               minval=-bound, maxval=bound)  # [out, in]
        b = jnp.full((next_shape,), 0.1, dtype=jnp.float32)  # constant bias 0.1
        params.append((w.T, b))                              # store transposed [in, out]
        in_dim = next_shape
    return params


# ---------------- Pure-JAX reference ----------------
def mlp_base_ref(x, params, apply_relu_last=True):
    out = x
    for i, (w_t, b) in enumerate(params):
        out = out @ w_t + b
        if i < len(params) - 1 or apply_relu_last:
            out = jnp.maximum(out, 0.0)
    return out


if __name__ == "__main__":
    key = jax.random.PRNGKey(0)
    batch = 8
    input_shape = 32
    hidden_shapes = [64, 64, 32]

    key, xk, pk = jax.random.split(key, 3)
    x = jax.random.normal(xk, (batch, input_shape), dtype=jnp.float32)
    params = init_mlp_params(pk, input_shape, hidden_shapes)

    y_ref = mlp_base_ref(x, params)

    # f32 path (default) — tight tolerance.
    fwd_f32 = jax.jit(functools.partial(mlp_base_forward, compute_dtype=jnp.float32))
    y = jax.block_until_ready(fwd_f32(x, params))
    np.testing.assert_allclose(np.asarray(y), np.asarray(y_ref), rtol=1e-5, atol=1e-5)

    # bf16 input/weight path (v6e/v7x MXU fast path), f32 accumulation — loose tolerance.
    fwd_bf16 = jax.jit(functools.partial(mlp_base_forward, compute_dtype=jnp.bfloat16))
    y16 = jax.block_until_ready(fwd_bf16(x, params))
    np.testing.assert_allclose(np.asarray(y16), np.asarray(y_ref), rtol=5e-2, atol=5e-2)

    print("KERNEL_OK")
</pallas_src>

<mosaic_0001>
module attributes {stable_mosaic.version = 11 : i64} {
  func.func @_fused_mlp_kernel(%arg0: i32, %arg1: memref<8x128xf32, #tpu.memory_space<vmem>>, %arg2: memref<128x128xf32, #tpu.memory_space<vmem>>, %arg3: memref<1x128xf32, #tpu.memory_space<vmem>>, %arg4: memref<128x128xf32, #tpu.memory_space<vmem>>, %arg5: memref<1x128xf32, #tpu.memory_space<vmem>>, %arg6: memref<128x128xf32, #tpu.memory_space<vmem>>, %arg7: memref<1x128xf32, #tpu.memory_space<vmem>>, %arg8: memref<8x128xf32, #tpu.memory_space<vmem>>) attributes {dimension_semantics = [#tpu.dimension_semantics<parallel>], iteration_bounds = array<i64: 1>, scalar_prefetch = 0 : i64, scratch_operands = 0 : i64, tpu.core_type = #tpu.core_type<tc>, window_params = [{transform_indices = @transform_0, window_bounds = array<i64: 8, 128>}, {pipeline_mode = #tpu.pipeline_mode<synchronous>, transform_indices = @transform_1, window_bounds = array<i64: 128, 128>}, {pipeline_mode = #tpu.pipeline_mode<synchronous>, transform_indices = @transform_2, window_bounds = array<i64: 1, 128>}, {pipeline_mode = #tpu.pipeline_mode<synchronous>, transform_indices = @transform_3, window_bounds = array<i64: 128, 128>}, {pipeline_mode = #tpu.pipeline_mode<synchronous>, transform_indices = @transform_4, window_bounds = array<i64: 1, 128>}, {pipeline_mode = #tpu.pipeline_mode<synchronous>, transform_indices = @transform_5, window_bounds = array<i64: 128, 128>}, {pipeline_mode = #tpu.pipeline_mode<synchronous>, transform_indices = @transform_6, window_bounds = array<i64: 1, 128>}, {transform_indices = @transform_7, window_bounds = array<i64: 8, 128>}]} {
    %c0 = arith.constant 0 : index
    %c0_0 = arith.constant 0 : index
    %0 = vector.load %arg1[%c0, %c0_0] : memref<8x128xf32, #tpu.memory_space<vmem>>, vector<8x128xf32>
    %c0_1 = arith.constant 0 : index
    %c0_2 = arith.constant 0 : index
    %1 = vector.load %arg2[%c0_1, %c0_2] : memref<128x128xf32, #tpu.memory_space<vmem>>, vector<128x128xf32>
    %c0_3 = arith.constant 0 : index
    %c0_4 = arith.constant 0 : index
    %2 = vector.load %arg3[%c0_3, %c0_4] : memref<1x128xf32, #tpu.memory_space<vmem>>, vector<1x128xf32>
    %cst = arith.constant dense<0.000000e+00> : vector<8x128xf32>
    %3 = tpu.matmul %0, %1, %cst {dimension_numbers = #tpu.dot_dimension_numbers<[1], [0], [0], [1], [0, 0, 1, 1], [], []>} : vector<8x128xf32>, vector<128x128xf32>, vector<8x128xf32> -> vector<8x128xf32>
    %4 = vector.broadcast %2 : vector<1x128xf32> to vector<8x128xf32>
    %5 = arith.addf %3, %4 : vector<8x128xf32>
    %cst_5 = arith.constant 0.000000e+00 : f32
    %6 = vector.broadcast %cst_5 : f32 to vector<8x128xf32>
    %7 = arith.maximumf %5, %6 : vector<8x128xf32>
    %c0_6 = arith.constant 0 : index
    %c0_7 = arith.constant 0 : index
    %8 = vector.load %arg4[%c0_6, %c0_7] : memref<128x128xf32, #tpu.memory_space<vmem>>, vector<128x128xf32>
    %c0_8 = arith.constant 0 : index
    %c0_9 = arith.constant 0 : index
    %9 = vector.load %arg5[%c0_8, %c0_9] : memref<1x128xf32, #tpu.memory_space<vmem>>, vector<1x128xf32>
    %cst_10 = arith.constant dense<0.000000e+00> : vector<8x128xf32>
    %10 = tpu.matmul %7, %8, %cst_10 {dimension_numbers = #tpu.dot_dimension_numbers<[1], [0], [0], [1], [0, 0, 1, 1], [], []>} : vector<8x128xf32>, vector<128x128xf32>, vector<8x128xf32> -> vector<8x128xf32>
    %11 = vector.broadcast %9 : vector<1x128xf32> to vector<8x128xf32>
    %12 = arith.addf %10, %11 : vector<8x128xf32>
    %cst_11 = arith.constant 0.000000e+00 : f32
    %13 = vector.broadcast %cst_11 : f32 to vector<8x128xf32>
    %14 = arith.maximumf %12, %13 : vector<8x128xf32>
    %c0_12 = arith.constant 0 : index
    %c0_13 = arith.constant 0 : index
    %15 = vector.load %arg6[%c0_12, %c0_13] : memref<128x128xf32, #tpu.memory_space<vmem>>, vector<128x128xf32>
    %c0_14 = arith.constant 0 : index
    %c0_15 = arith.constant 0 : index
    %16 = vector.load %arg7[%c0_14, %c0_15] : memref<1x128xf32, #tpu.memory_space<vmem>>, vector<1x128xf32>
    %cst_16 = arith.constant dense<0.000000e+00> : vector<8x128xf32>
    %17 = tpu.matmul %14, %15, %cst_16 {dimension_numbers = #tpu.dot_dimension_numbers<[1], [0], [0], [1], [0, 0, 1, 1], [], []>} : vector<8x128xf32>, vector<128x128xf32>, vector<8x128xf32> -> vector<8x128xf32>
    %18 = vector.broadcast %16 : vector<1x128xf32> to vector<8x128xf32>
    %19 = arith.addf %17, %18 : vector<8x128xf32>
    %cst_17 = arith.constant 0.000000e+00 : f32
    %20 = vector.broadcast %cst_17 : f32 to vector<8x128xf32>
    %21 = arith.maximumf %19, %20 : vector<8x128xf32>
    %c0_18 = arith.constant 0 : index
    %c0_19 = arith.constant 0 : index
    %22 = vector.load %arg8[%c0_18, %c0_19] : memref<8x128xf32, #tpu.memory_space<vmem>>, vector<8x128xf32>
    tpu.vector_store %arg8[%c0_18, %c0_19], %21 {strides = array<i32>} : memref<8x128xf32, #tpu.memory_space<vmem>>, vector<8x128xf32>,
    return
  }
  func.func @transform_0(%arg0: i32) -> (i32, i32) {
    %c0_i32 = arith.constant 0 : i32
    %c0_i32_0 = arith.constant 0 : i32
    return %arg0, %c0_i32 : i32, i32
  }
  func.func @transform_1(%arg0: i32) -> (i32, i32) {
    %c0_i32 = arith.constant 0 : i32
    %c0_i32_0 = arith.constant 0 : i32
    %c0_i32_1 = arith.constant 0 : i32
    return %c0_i32, %c0_i32_0 : i32, i32
  }
  func.func @transform_2(%arg0: i32) -> (i32, i32) {
    %c0_i32 = arith.constant 0 : i32
    %c0_i32_0 = arith.constant 0 : i32
    %c0_i32_1 = arith.constant 0 : i32
    return %c0_i32, %c0_i32_0 : i32, i32
  }
  func.func @transform_3(%arg0: i32) -> (i32, i32) {
    %c0_i32 = arith.constant 0 : i32
    %c0_i32_0 = arith.constant 0 : i32
    %c0_i32_1 = arith.constant 0 : i32
    return %c0_i32, %c0_i32_0 : i32, i32
  }
  func.func @transform_4(%arg0: i32) -> (i32, i32) {
    %c0_i32 = arith.constant 0 : i32
    %c0_i32_0 = arith.constant 0 : i32
    %c0_i32_1 = arith.constant 0 : i32
    return %c0_i32, %c0_i32_0 : i32, i32
  }
  func.func @transform_5(%arg0: i32) -> (i32, i32) {
    %c0_i32 = arith.constant 0 : i32
    %c0_i32_0 = arith.constant 0 : i32
    %c0_i32_1 = arith.constant 0 : i32
    return %c0_i32, %c0_i32_0 : i32, i32
  }
  func.func @transform_6(%arg0: i32) -> (i32, i32) {
    %c0_i32 = arith.constant 0 : i32
    %c0_i32_0 = arith.constant 0 : i32
    %c0_i32_1 = arith.constant 0 : i32
    return %c0_i32, %c0_i32_0 : i32, i32
  }
  func.func @transform_7(%arg0: i32) -> (i32, i32) {
    %c0_i32 = arith.constant 0 : i32
    %c0_i32_0 = arith.constant 0 : i32
    return %arg0, %c0_i32 : i32, i32
  }
}

</mosaic_0001>

<bundles_post_ra>
// kernel: mlp_base_forward.1
= control target key start
LH: loop header
LB: loop body
LE: loop exit
PB: predicated region body
PF: predicated region fallthrough
CT: control target
= control target key end

     0   :  { %s398_s0 = inlined_call_operand.vmem [shape: f32[8,128], index: 0, kind: input, shape index: {}]   ;;  %s399_s1 = inlined_call_operand.vmem [shape: f32[128,128], index: 1, kind: input, shape index: {}]   ;;  %s400_s2 = inlined_call_operand.vmem [shape: f32[1,128], index: 2, kind: input, shape index: {}]   ;;  %s401_s3 = inlined_call_operand.vmem [shape: f32[128,128], index: 3, kind: input, shape index: {}]   ;;  %s402_s4 = inlined_call_operand.vmem [shape: f32[1,128], index: 4, kind: input, shape index: {}]   ;;  %s403_s5 = inlined_call_operand.vmem [shape: f32[128,128], index: 5, kind: input, shape index: {}]   ;;  %s404_s6 = inlined_call_operand.vmem [shape: f32[1,128], index: 6, kind: input, shape index: {}]   ;;  %s405_s7 = inlined_call_operand.hbm [shape: f32[8,128], index: 7, kind: output, shape index: {}]  }
   0x1   :  { %v43_v0 = vld [vmem:[%s399_s1 + $0x78] sm:$0xff]  ;;  %v42_v1 = vld [vmem:[%s399_s1 + $0x70] sm:$0xff]  ;;  %v41_v2 = vld [vmem:[%s399_s1 + $0x68] sm:$0xff] }
   0x2   :  { %48 = vmatpush.msra.mxu0 %v43_v0  ;;  %v40_v3 = vld [vmem:[%s399_s1 + $0x60] sm:$0xff]  ;;  %v84_v4 = vld [vmem:[%s401_s3 + $0x78] sm:$0xff]  ;;  %v83_v6 = vld [vmem:[%s401_s3 + $0x70] sm:$0xff] }
   0x3   :  { %v39_v5 = vld [vmem:[%s399_s1 + $0x58] sm:$0xff]  ;;  %89 = vmatpush.msra.mxu1 %v84_v4  ;;  %v82_v7 = vld [vmem:[%s401_s3 + $0x68] sm:$0xff]  ;;  %v38_v8 = vld [vmem:[%s399_s1 + $0x50] sm:$0xff] }
   0x4   :  { %49 = vmatpush.msra.mxu0 %v42_v1  ;;  %v81_v9 = vld [vmem:[%s401_s3 + $0x60] sm:$0xff]  ;;  %v37_v10 = vld [vmem:[%s399_s1 + $0x48] sm:$0xff]  ;;  %v80_v11 = vld [vmem:[%s401_s3 + $0x58] sm:$0xff] }
   0x5   :  { %90 = vmatpush.msra.mxu1 %v83_v6 }
   0x6   :  { %50 = vmatpush.msra.mxu0 %v41_v2 }
   0x7   :  { %91 = vmatpush.msra.mxu1 %v82_v7 }
   0x8   :  { %51 = vmatpush.msra.mxu0 %v40_v3 }
   0xa   :  { %52 = vmatpush.msra.mxu0 %v39_v5 }
   0xc   :  { %53 = vmatpush.msra.mxu0 %v38_v8 }
   0xd   :  { %12 = vsyncpa [#allocation3], 0  ;;  %v36_v12 = vld [vmem:[%s399_s1 + $0x40] sm:$0xff]  ;;  %92 = vmatpush.msra.mxu1 %v81_v9  ;;  %v79_v13 = vld [vmem:[%s401_s3 + $0x50] sm:$0xff]  ;;  %s198_s29 = smov [#allocation2]  }
   0xe   :  { %54 = vmatpush.msra.mxu0 %v37_v10  ;;  %v35_v14 = vld [vmem:[%s399_s1 + $0x38] sm:$0xff]  ;;  %v78_v15 = vld [vmem:[%s401_s3 + $0x48] sm:$0xff]  ;;  %v34_v16 = vld [vmem:[%s399_s1 + $0x30] sm:$0xff]  ;;  %s157_s30 = sshll.u32 %s198_s29, 4  ;;  %s158_s30 = int_to_ptr.vmem [resolvable:$true] %s157_s30 }
   0xf   :  { %93 = vmatpush.msra.mxu1 %v80_v11  ;;  %v77_v17 = vld [vmem:[%s401_s3 + $0x40] sm:$0xff]  ;;  %v33_v18 = vld [vmem:[%s399_s1 + $0x28] sm:$0xff]  ;;  %v76_v19 = vld [vmem:[%s401_s3 + $0x38] sm:$0xff] }
  0x10   :  { %55 = vmatpush.msra.mxu0 %v36_v12  ;;  %v32_v20 = vld [vmem:[%s399_s1 + $0x20] sm:$0xff]  ;;  %v75_v21 = vld [vmem:[%s401_s3 + $0x30] sm:$0xff]  ;;  %v31_v22 = vld [vmem:[%s399_s1 + $0x18] sm:$0xff] }
  0x11   :  { %94 = vmatpush.msra.mxu1 %v79_v13  ;;  %v74_v23 = vld [vmem:[%s401_s3 + $0x28] sm:$0xff]  ;;  %v30_v24 = vld [vmem:[%s399_s1 + $0x10] sm:$0xff]  ;;  %v73_v25 = vld [vmem:[%s401_s3 + $0x20] sm:$0xff] }
  0x12   :  { %56 = vmatpush.msra.mxu0 %v35_v14  ;;  %v29_v26 = vld [vmem:[%s399_s1 + $0x8] sm:$0xff]  ;;  %v72_v27 = vld [vmem:[%s401_s3 + $0x18] sm:$0xff]  ;;  %v28_v28 = vld [vmem:[%s399_s1] sm:$0xff] }
  0x13   :  { %95 = vmatpush.msra.mxu1 %v78_v15  ;;  %v27_v29 = vld [vmem:[%s398_s0] sm:$0xff]  ;;  %v71_v30 = vld [vmem:[%s401_s3 + $0x10] sm:$0xff]  ;;  %v70_v31 = vld [vmem:[%s401_s3 + $0x8] sm:$0xff] }
  0x14   :  { %57 = vmatpush.msra.mxu0 %v34_v16  ;;  %v69_v32 = vld [vmem:[%s401_s3] sm:$0xff]  ;;  %v125_v33 = vld [vmem:[%s403_s5 + $0x78] sm:$0xff]  ;;  %v124_v34 = vld [vmem:[%s403_s5 + $0x70] sm:$0xff] }
  0x15   :  { %96 = vmatpush.msra.mxu1 %v77_v17  ;;  %130 = vmatpush.msra.mxu2 %v125_v33  ;;  %v123_v35 = vld [vmem:[%s403_s5 + $0x68] sm:$0xff]  ;;  %v122_v36 = vld [vmem:[%s403_s5 + $0x60] sm:$0xff]  ;;  %v121_v37 = vld [vmem:[%s403_s5 + $0x58] sm:$0xff] }
  0x16   :  { %58 = vmatpush.msra.mxu0 %v33_v18  ;;  %v120_v38 = vld [vmem:[%s403_s5 + $0x50] sm:$0xff]  ;;  %v119_v39 = vld [vmem:[%s403_s5 + $0x48] sm:$0xff]  ;;  %v118_v40 = vld [vmem:[%s403_s5 + $0x40] sm:$0xff] }
  0x17   :  { %97 = vmatpush.msra.mxu1 %v76_v19  ;;  %131 = vmatpush.msra.mxu2 %v124_v34  ;;  %v117_v41 = vld [vmem:[%s403_s5 + $0x38] sm:$0xff]  ;;  %v116_v42 = vld [vmem:[%s403_s5 + $0x30] sm:$0xff]  ;;  %v115_v43 = vld [vmem:[%s403_s5 + $0x28] sm:$0xff] }
  0x18   :  { %59 = vmatpush.msra.mxu0 %v32_v20  ;;  %v114_v44 = vld [vmem:[%s403_s5 + $0x20] sm:$0xff]  ;;  %v113_v45 = vld [vmem:[%s403_s5 + $0x18] sm:$0xff]  ;;  %v112_v50 = vld [vmem:[%s403_s5 + $0x10] sm:$0xff] }
  0x19   :  { %98 = vmatpush.msra.mxu1 %v75_v21  ;;  %132 = vmatpush.msra.mxu2 %v123_v35  ;;  %v169_v46 = vld [vmem:[%s400_s2] ss:$0 sm:$0xff]  ;;  %v111_v51 = vld [vmem:[%s403_s5 + $0x8] sm:$0xff] }
  0x1a   :  { %60 = vmatpush.msra.mxu0 %v31_v22  ;;  %v110_v52 = vld [vmem:[%s403_s5] sm:$0xff]  ;;  %s159_s5 = sshll.u32 %s405_s7, 4  ;;  %s160_s5 = int_to_ptr.hbm [resolvable:$true] %s159_s5 }
  0x1b   :  { %99 = vmatpush.msra.mxu1 %v74_v23  ;;  %133 = vmatpush.msra.mxu2 %v122_v36  ;;  %v170_v53 = vld [vmem:[%s402_s4] ss:$0 sm:$0xff] }
  0x1c   :  { %61 = vmatpush.msra.mxu0 %v30_v24  ;;  %v171_v57 = vld [vmem:[%s404_s6] ss:$0 sm:$0xff] }
  0x1d   :  { %100 = vmatpush.msra.mxu1 %v73_v25  ;;  %134 = vmatpush.msra.mxu2 %v121_v37 }
  0x1e   :  { %62 = vmatpush.msra.mxu0 %v29_v26 }
  0x1f   :  { %101 = vmatpush.msra.mxu1 %v72_v27  ;;  %135 = vmatpush.msra.mxu2 %v120_v38 }
  0x20   :  { %63 = vmatpush.msra.mxu0 %v28_v28 }
  0x21   :  { %64 = vmatmul.f32.vlgmr.msra.gmra.mxu0 %v27_v29  ;;  %102 = vmatpush.msra.mxu1 %v71_v30 }
  0x22   :  { %136 = vmatpush.msra.mxu2 %v119_v39 }
  0x23   :  { %103 = vmatpush.msra.mxu1 %v70_v31 }
  0x24   :  { %137 = vmatpush.msra.mxu2 %v118_v40 }
  0x25   :  { %104 = vmatpush.msra.mxu1 %v69_v32 }
  0x26   :  { %138 = vmatpush.msra.mxu2 %v117_v41 }
  0x28   :  { %139 = vmatpush.msra.mxu2 %v116_v42 }
  0x2a   :  { %140 = vmatpush.msra.mxu2 %v115_v43 }
  0x2c   :  { %141 = vmatpush.msra.mxu2 %v114_v44 }
  0x2e   :  { %142 = vmatpush.msra.mxu2 %v113_v45 }
  0x30   :  { %143 = vmatpush.msra.mxu2 %v112_v50 }
  0x32   :  { %144 = vmatpush.msra.mxu2 %v111_v51 }
  0x34   :  { %145 = vmatpush.msra.mxu2 %v110_v52 }
  0x9e   :  { %v65_v47 = vpop.f32.mrf.mxu0 }
  0x9f   :  { %v66_v48 = vadd.f32 %v169_v46, %v65_v47 }
  0xa1   :  { %v68_v49 = vmax.f32 %v66_v48, 0.0 }
  0xa3   :  { %105 = vmatmul.f32.vlgmr.msra.gmra.mxu1 %v68_v49 }
 0x120   :  { %v106_v54 = vpop.f32.mrf.mxu1 }
 0x121   :  { %v107_v55 = vadd.f32 %v170_v53, %v106_v54 }
 0x123   :  { %v109_v56 = vmax.f32 %v107_v55, 0.0 }
 0x125   :  { %146 = vmatmul.f32.vlgmr.msra.gmra.mxu2 %v109_v56 }
 0x1a8   :  { %v147_v58 = vpop.f32.mrf.mxu2 }
 0x1a9   :  { %v148_v59 = vadd.f32 %v171_v57, %v147_v58 }
 0x1ab   :  { %v150_v60 = vmax.f32 %v148_v59, 0.0 }
 0x1ad   :  { %151 = vst [vmem:[#allocation2] sm:$0xff] %v150_v60 }
 0x1ae   :  { %162 = dma.vmem_to_hbm [thread:$0]  %s158_s30, 128, %s160_s5, [#allocation3]  }
 0x1af   :  { %196 = dma.done.wait [#allocation3], 128  }
 0x1b0   :  { %197 = vsyncadd [#allocation3], 4294967168 }
 0x1b1   :  { %167 = vsyncpa [#allocation3], 1 }

</bundles_post_ra>
